<compile_context>
chip_gen: v7x
topology: tpu7x:2x2x1
jax: 0.10.0
libtpu: 0.0.40
codegen_flags: <defaults>
</compile_context>

<pallas_src>
import functools
import math

import jax
import jax.numpy as jnp
from jax.experimental import pallas as pl
from jax.experimental.pallas import tpu as pltpu


def _round_up(x, m):
    return ((x + m - 1) // m) * m


_DMA_BUFS = 8                 # in-flight row DMAs in the large-vocab fallback
_MAX_TOKENS_PER_CALL = 65536  # bounds scalar-prefetch SMEM (ids) per pallas_call


# --------------------------------------------------------------------------
# Path 1: one-hot MXU gather (bf16 tables, small vocab). Table resident in
# VMEM (single copy); no scalar prefetch (ids come in as a (T, 1) VMEM block).
# --------------------------------------------------------------------------
def _onehot_kernel(ids_col_ref, w_ref, out_ref, *, block_tokens, vocab_pad):
    ids = ids_col_ref[...]                                              # (T, 1)
    cols = jax.lax.broadcasted_iota(jnp.int32, (block_tokens, vocab_pad), 1)
    onehot = (cols == ids).astype(w_ref.dtype)                          # (T, Vp)
    # Exactly one 1.0 per row; bf16 inputs -> single MXU pass, f32 accumulate,
    # so the gathered values are reproduced exactly.
    out_ref[...] = jnp.dot(
        onehot, w_ref[...], preferred_element_type=jnp.float32
    ).astype(out_ref.dtype)


def _onehot_lookup(ids_col, w_pad, n_pad, block_tokens, emb_dim, vmem_limit):
    vocab_pad = w_pad.shape[0]
    kernel = functools.partial(
        _onehot_kernel, block_tokens=block_tokens, vocab_pad=vocab_pad)
    return pl.pallas_call(
        kernel,
        out_shape=jax.ShapeDtypeStruct((n_pad, emb_dim), w_pad.dtype),
        grid=(n_pad // block_tokens,),
        in_specs=[
            pl.BlockSpec((block_tokens, 1), lambda i: (i, 0)),
            # Whole table, single VMEM copy (no double buffering).
            pl.BlockSpec(memory_space=pltpu.MemorySpace.VMEM),
        ],
        out_specs=pl.BlockSpec((block_tokens, emb_dim), lambda i: (i, 0)),
        compiler_params=pltpu.CompilerParams(
            dimension_semantics=("parallel",),
            vmem_limit_bytes=vmem_limit,
        ),
    )(ids_col, w_pad)


# --------------------------------------------------------------------------
# Path 2: row-copy gather with the table resident in VMEM (single copy).
# Ids arrive via scalar prefetch (SMEM); 8 rows are gathered into an (8, D)
# tile and written with one unmasked store per group.
# --------------------------------------------------------------------------
def _rowcopy_kernel(ids_smem, w_ref, out_ref, *, block_tokens, unroll):
    base = pl.program_id(0) * block_tokens
    n_groups = block_tokens // 8

    def gather8(g, carry):
        t0 = pl.multiple_of(g * 8, 8)
        rows = [w_ref[pl.ds(ids_smem[base + t0 + r], 1), :] for r in range(8)]
        out_ref[pl.ds(t0, 8), :] = jnp.concatenate(rows, axis=0)
        return carry

    jax.lax.fori_loop(0, n_groups, gather8, 0, unroll=unroll)


def _rowcopy_lookup(flat_ids, w_pad, n_pad, block_tokens, emb_dim, vmem_limit):
    n_groups = block_tokens // 8
    kernel = functools.partial(
        _rowcopy_kernel, block_tokens=block_tokens, unroll=min(8, n_groups))
    return pl.pallas_call(
        kernel,
        out_shape=jax.ShapeDtypeStruct((n_pad, emb_dim), w_pad.dtype),
        grid_spec=pltpu.PrefetchScalarGridSpec(
            num_scalar_prefetch=1,                 # flat token ids -> SMEM
            grid=(n_pad // block_tokens,),
            in_specs=[
                # Whole table, single VMEM copy (no double buffering).
                pl.BlockSpec(memory_space=pltpu.MemorySpace.VMEM),
            ],
            out_specs=pl.BlockSpec((block_tokens, emb_dim),
                                   lambda i, ids: (i, 0)),
        ),
        compiler_params=pltpu.CompilerParams(
            dimension_semantics=("parallel",),
            vmem_limit_bytes=vmem_limit,
        ),
    )(flat_ids, w_pad)


# --------------------------------------------------------------------------
# Path 3 (fallback): table too large for VMEM. Table stays in HBM; each grid
# step gathers a block of T tokens with a rolling window of manual row DMAs
# that land directly in the dense (T, D) output block.
# --------------------------------------------------------------------------
def _dma_gather_kernel(ids_smem, w_hbm, out_ref, sems, *, block_tokens, nbuf):
    base = pl.program_id(0) * block_tokens

    def row_copy(t, slot):
        return pltpu.make_async_copy(
            w_hbm.at[pl.ds(ids_smem[base + t], 1), :],
            out_ref.at[pl.ds(t, 1), :],
            sems.at[slot],
        )

    # Prime: first `nbuf` row DMAs in flight.
    for t in range(min(nbuf, block_tokens)):
        row_copy(t, t).start()

    # Rolling window: wait on row t, then reuse its semaphore slot for row t+nbuf.
    @pl.loop(0, block_tokens)
    def _(t):
        slot = t % nbuf
        row_copy(t, slot).wait()

        @pl.when(t + nbuf < block_tokens)
        def _():
            row_copy(t + nbuf, slot).start()


def _dma_gather_lookup(flat_ids, weight, n_pad, block_tokens, emb_dim):
    nbuf = min(_DMA_BUFS, block_tokens)
    kernel = functools.partial(
        _dma_gather_kernel, block_tokens=block_tokens, nbuf=nbuf)
    return pl.pallas_call(
        kernel,
        out_shape=jax.ShapeDtypeStruct((n_pad, emb_dim), weight.dtype),
        grid_spec=pltpu.PrefetchScalarGridSpec(
            num_scalar_prefetch=1,                 # flat token ids -> SMEM
            grid=(n_pad // block_tokens,),
            in_specs=[pl.BlockSpec(memory_space=pl.ANY)],   # table stays in HBM
            out_specs=pl.BlockSpec((block_tokens, emb_dim),
                                   lambda i, ids: (i, 0)),
            scratch_shapes=[pltpu.SemaphoreType.DMA((nbuf,))],
        ),
        compiler_params=pltpu.CompilerParams(
            dimension_semantics=("parallel",),     # independent token blocks
        ),
    )(flat_ids, weight)


# --------------------------------------------------------------------------
# Wrapper
# --------------------------------------------------------------------------
def _lookup_chunk(flat_ids, weight, strategy, vmem_budget):
    """Gather weight[flat_ids] for one chunk of token ids."""
    (n,) = flat_ids.shape
    V, D = weight.shape
    itemsize = jnp.dtype(weight.dtype).itemsize

    vocab_onehot = _round_up(V, 256)   # MXU-friendly K (v6e/v7x 256-wide MXU)
    vocab_row = _round_up(V, 8)        # sublane-friendly resident table

    if strategy is None:
        # One-hot path only for bf16 tables (exact through a single bf16 MXU
        # pass); f32 tables use the row-copy gather (exact, and avoids f32
        # MXU precision/perf issues, esp. on v5e).
        onehot_ok = (weight.dtype == jnp.bfloat16) and vocab_onehot <= 1024
        t_oh = min(256, _round_up(n, 8))
        onehot_bytes = (vocab_onehot * D * itemsize           # table, single copy
                        + 2 * t_oh * D * itemsize             # double-buffered out
                        + 2 * t_oh * 128 * 4                  # (T,1) id blocks
                        + 2 * t_oh * vocab_onehot * 4         # one-hot + iota temps
                        + (1 << 20))                          # headroom
        t_rc = min(1024, _round_up(n, 8))
        rowcopy_bytes = (vocab_row * D * itemsize             # table, single copy
                         + 2 * t_rc * D * itemsize            # double-buffered out
                         + (1 << 20))                         # headroom
        if onehot_ok and onehot_bytes <= vmem_budget:
            strategy = "onehot"
        elif rowcopy_bytes <= vmem_budget:
            strategy = "rowcopy"
        else:
            strategy = "dma"

    if strategy == "onehot":
        block = min(256, _round_up(n, 8))
        n_pad = _round_up(n, block)
        ids = flat_ids if n_pad == n else jnp.pad(flat_ids, (0, n_pad - n))
        w_pad = weight if vocab_onehot == V else jnp.pad(
            weight, ((0, vocab_onehot - V), (0, 0)))
        out = _onehot_lookup(ids.reshape(n_pad, 1), w_pad, n_pad, block, D,
                             vmem_budget)
    elif strategy == "rowcopy":
        block = min(1024, _round_up(n, 8))
        n_pad = _round_up(n, block)
        ids = flat_ids if n_pad == n else jnp.pad(flat_ids, (0, n_pad - n))
        w_pad = weight if vocab_row == V else jnp.pad(
            weight, ((0, vocab_row - V), (0, 0)))
        out = _rowcopy_lookup(ids, w_pad, n_pad, block, D, vmem_budget)
    elif strategy == "dma":
        block = min(256, _round_up(n, 8))
        n_pad = _round_up(n, block)
        ids = flat_ids if n_pad == n else jnp.pad(flat_ids, (0, n_pad - n))
        out = _dma_gather_lookup(ids, weight, n_pad, block, D)
    else:
        raise ValueError(f"unknown strategy {strategy!r}")

    return out[:n]


def token_embedder_forward(ids, weight, *, strategy=None,
                           max_tokens_per_call=_MAX_TOKENS_PER_CALL):
    """Pallas embedding lookup.

    ids:    integer token ids of any shape
    weight: (V, D) embedding table
    returns ids.shape + (D,), same dtype as weight
    """
    lead = ids.shape
    V, D = weight.shape
    n_total = math.prod(lead) if lead else 1
    flat = ids.reshape(n_total).astype(jnp.int32)

    # Generation-aware VMEM sizing (64 MiB on v7x, 128 MiB on v5e/v6e); the
    # resident table is a single copy, so 0.85 of capacity is a safe budget.
    try:
        vmem_cap = int(pltpu.get_tpu_info().vmem_capacity_bytes)
    except Exception:
        vmem_cap = 64 * 1024 * 1024
    vmem_budget = int(vmem_cap * 0.85)

    if n_total <= max_tokens_per_call:
        out = _lookup_chunk(flat, weight, strategy, vmem_budget)
    else:
        # Chunk so the scalar-prefetch id array's SMEM footprint stays bounded.
        parts = [
            _lookup_chunk(flat[s:s + max_tokens_per_call], weight, strategy,
                          vmem_budget)
            for s in range(0, n_total, max_tokens_per_call)
        ]
        out = jnp.concatenate(parts, axis=0)

    return out.reshape(*lead, D)


def build_params(key, word_num, emb_dim, dtype=jnp.float32):
    # Mirrors: self.embeddings.weight.data.uniform_(-1, 1)
    w = jax.random.uniform(key, (word_num, emb_dim), dtype=jnp.float32,
                           minval=-1.0, maxval=1.0)
    return w.astype(dtype)


if __name__ == "__main__":
    # Config consistent with the module's __init__:
    # token2id: '<PAD>' -> 0, '<OOV>' -> 1, plus 30 synthetic tokens.
    token2id = {"<PAD>": 0, "<OOV>": 1}
    for t in range(30):
        token2id[f"tok{t}"] = len(token2id)
    word_num = len(token2id)        # 32
    emb_dim = 128

    key = jax.random.PRNGKey(0)
    k_w, k_ids, k_w2, k_ids2, k_w3, k_ids3, k_w4, k_ids4 = jax.random.split(key, 8)

    # --- 1) small module-sized config (f32 -> resident row-copy path) ---
    weight = build_params(k_w, word_num, emb_dim)
    B, S = 2, 8
    ids = jax.random.randint(k_ids, (B, S), 0, word_num, dtype=jnp.int32)
    out = jax.block_until_ready(token_embedder_forward(ids, weight))
    ref = weight[ids.reshape(-1)].reshape(B, S, emb_dim)
    assert out.shape == (B, S, emb_dim) and out.dtype == weight.dtype
    assert jnp.allclose(out, ref), "mismatch: row-copy small config"

    # --- 2) multiple token blocks + vocab/N padding (f32 row-copy path) ---
    V2 = 500
    w2 = build_params(k_w2, V2, emb_dim)
    ids2 = jax.random.randint(k_ids2, (4, 300), 0, V2, dtype=jnp.int32)
    out2 = jax.block_until_ready(token_embedder_forward(ids2, w2))
    ref2 = w2[ids2.reshape(-1)].reshape(4, 300, emb_dim)
    assert jnp.allclose(out2, ref2), "mismatch: row-copy multi-block"

    # --- 3) bf16 table -> one-hot MXU path ---
    V3 = 40
    w3 = build_params(k_w3, V3, emb_dim, dtype=jnp.bfloat16)
    ids3 = jax.random.randint(k_ids3, (2, 16), 0, V3, dtype=jnp.int32)
    out3 = jax.block_until_ready(token_embedder_forward(ids3, w3))
    ref3 = w3[ids3.reshape(-1)].reshape(2, 16, emb_dim)
    assert out3.dtype == jnp.bfloat16
    assert jnp.allclose(out3, ref3), "mismatch: one-hot bf16 path"

    # --- 4) forced large-vocab fallback: manual rolling row-DMA gather ---
    V4 = 300
    w4 = build_params(k_w4, V4, emb_dim)
    ids4 = jax.random.randint(k_ids4, (3, 100), 0, V4, dtype=jnp.int32)
    out4 = jax.block_until_ready(
        token_embedder_forward(ids4, w4, strategy="dma"))
    ref4 = w4[ids4.reshape(-1)].reshape(3, 100, emb_dim)
    assert jnp.allclose(out4, ref4), "mismatch: manual-DMA fallback"

    print("KERNEL_OK")
</pallas_src>

<mosaic_0001>
module attributes {stable_mosaic.version = 11 : i64} {
  func.func @_rowcopy_kernel(%arg0: i32, %arg1: memref<16xi32, #tpu.memory_space<smem>>, %arg2: memref<32x128xf32, #tpu.memory_space<vmem>>, %arg3: memref<16x128xf32, #tpu.memory_space<vmem>>) attributes {dimension_semantics = [#tpu.dimension_semantics<parallel>], iteration_bounds = array<i64: 1>, scalar_prefetch = 1 : i64, scratch_operands = 0 : i64, tpu.core_type = #tpu.core_type<tc>, window_params = [{pipeline_mode = #tpu.pipeline_mode<synchronous>, transform_indices = @transform_0, window_bounds = array<i64: 32, 128>}, {transform_indices = @transform_1, window_bounds = array<i64: 16, 128>}]} {
    %c16_i32 = arith.constant 16 : i32
    %0 = arith.muli %arg0, %c16_i32 : i32
    %c0_i32 = arith.constant 0 : i32
    %c8_i32 = arith.constant 8 : i32
    %1 = arith.muli %c0_i32, %c8_i32 : i32
    %2 = tpu.assume_multiple %1, 8 : i32
    %3 = arith.addi %0, %2 : i32
    %c0_i32_0 = arith.constant 0 : i32
    %4 = arith.addi %3, %c0_i32_0 : i32
    %5 = arith.index_cast %4 : i32 to index
    %6 = memref.load %arg1[%5] : memref<16xi32, #tpu.memory_space<smem>>
    %7 = arith.index_cast %6 : i32 to index
    %c0 = arith.constant 0 : index
    %8 = vector.load %arg2[%7, %c0] : memref<32x128xf32, #tpu.memory_space<vmem>>, vector<1x128xf32>
    %9 = arith.addi %0, %2 : i32
    %c1_i32 = arith.constant 1 : i32
    %10 = arith.addi %9, %c1_i32 : i32
    %11 = arith.index_cast %10 : i32 to index
    %12 = memref.load %arg1[%11] : memref<16xi32, #tpu.memory_space<smem>>
    %13 = arith.index_cast %12 : i32 to index
    %c0_1 = arith.constant 0 : index
    %14 = vector.load %arg2[%13, %c0_1] : memref<32x128xf32, #tpu.memory_space<vmem>>, vector<1x128xf32>
    %15 = arith.addi %0, %2 : i32
    %c2_i32 = arith.constant 2 : i32
    %16 = arith.addi %15, %c2_i32 : i32
    %17 = arith.index_cast %16 : i32 to index
    %18 = memref.load %arg1[%17] : memref<16xi32, #tpu.memory_space<smem>>
    %19 = arith.index_cast %18 : i32 to index
    %c0_2 = arith.constant 0 : index
    %20 = vector.load %arg2[%19, %c0_2] : memref<32x128xf32, #tpu.memory_space<vmem>>, vector<1x128xf32>
    %21 = arith.addi %0, %2 : i32
    %c3_i32 = arith.constant 3 : i32
    %22 = arith.addi %21, %c3_i32 : i32
    %23 = arith.index_cast %22 : i32 to index
    %24 = memref.load %arg1[%23] : memref<16xi32, #tpu.memory_space<smem>>
    %25 = arith.index_cast %24 : i32 to index
    %c0_3 = arith.constant 0 : index
    %26 = vector.load %arg2[%25, %c0_3] : memref<32x128xf32, #tpu.memory_space<vmem>>, vector<1x128xf32>
    %27 = arith.addi %0, %2 : i32
    %c4_i32 = arith.constant 4 : i32
    %28 = arith.addi %27, %c4_i32 : i32
    %29 = arith.index_cast %28 : i32 to index
    %30 = memref.load %arg1[%29] : memref<16xi32, #tpu.memory_space<smem>>
    %31 = arith.index_cast %30 : i32 to index
    %c0_4 = arith.constant 0 : index
    %32 = vector.load %arg2[%31, %c0_4] : memref<32x128xf32, #tpu.memory_space<vmem>>, vector<1x128xf32>
    %33 = arith.addi %0, %2 : i32
    %c5_i32 = arith.constant 5 : i32
    %34 = arith.addi %33, %c5_i32 : i32
    %35 = arith.index_cast %34 : i32 to index
    %36 = memref.load %arg1[%35] : memref<16xi32, #tpu.memory_space<smem>>
    %37 = arith.index_cast %36 : i32 to index
    %c0_5 = arith.constant 0 : index
    %38 = vector.load %arg2[%37, %c0_5] : memref<32x128xf32, #tpu.memory_space<vmem>>, vector<1x128xf32>
    %39 = arith.addi %0, %2 : i32
    %c6_i32 = arith.constant 6 : i32
    %40 = arith.addi %39, %c6_i32 : i32
    %41 = arith.index_cast %40 : i32 to index
    %42 = memref.load %arg1[%41] : memref<16xi32, #tpu.memory_space<smem>>
    %43 = arith.index_cast %42 : i32 to index
    %c0_6 = arith.constant 0 : index
    %44 = vector.load %arg2[%43, %c0_6] : memref<32x128xf32, #tpu.memory_space<vmem>>, vector<1x128xf32>
    %45 = arith.addi %0, %2 : i32
    %c7_i32 = arith.constant 7 : i32
    %46 = arith.addi %45, %c7_i32 : i32
    %47 = arith.index_cast %46 : i32 to index
    %48 = memref.load %arg1[%47] : memref<16xi32, #tpu.memory_space<smem>>
    %49 = arith.index_cast %48 : i32 to index
    %c0_7 = arith.constant 0 : index
    %50 = vector.load %arg2[%49, %c0_7] : memref<32x128xf32, #tpu.memory_space<vmem>>, vector<1x128xf32>
    %51 = tpu.concatenate %8, %14, %20, %26, %32, %38, %44, %50 in 0 : vector<1x128xf32>, vector<1x128xf32>, vector<1x128xf32>, vector<1x128xf32>, vector<1x128xf32>, vector<1x128xf32>, vector<1x128xf32>, vector<1x128xf32> -> vector<8x128xf32>
    %52 = arith.index_cast %2 : i32 to index
    %c0_8 = arith.constant 0 : index
    %53 = vector.load %arg3[%52, %c0_8] : memref<16x128xf32, #tpu.memory_space<vmem>>, vector<8x128xf32>
    tpu.vector_store %arg3[%52, %c0_8], %51 {strides = array<i32>} : memref<16x128xf32, #tpu.memory_space<vmem>>, vector<8x128xf32>,
    %c1_i32_9 = arith.constant 1 : i32
    %c8_i32_10 = arith.constant 8 : i32
    %54 = arith.muli %c1_i32_9, %c8_i32_10 : i32
    %55 = tpu.assume_multiple %54, 8 : i32
    %56 = arith.addi %0, %55 : i32
    %c0_i32_11 = arith.constant 0 : i32
    %57 = arith.addi %56, %c0_i32_11 : i32
    %58 = arith.index_cast %57 : i32 to index
    %59 = memref.load %arg1[%58] : memref<16xi32, #tpu.memory_space<smem>>
    %60 = arith.index_cast %59 : i32 to index
    %c0_12 = arith.constant 0 : index
    %61 = vector.load %arg2[%60, %c0_12] : memref<32x128xf32, #tpu.memory_space<vmem>>, vector<1x128xf32>
    %62 = arith.addi %0, %55 : i32
    %c1_i32_13 = arith.constant 1 : i32
    %63 = arith.addi %62, %c1_i32_13 : i32
    %64 = arith.index_cast %63 : i32 to index
    %65 = memref.load %arg1[%64] : memref<16xi32, #tpu.memory_space<smem>>
    %66 = arith.index_cast %65 : i32 to index
    %c0_14 = arith.constant 0 : index
    %67 = vector.load %arg2[%66, %c0_14] : memref<32x128xf32, #tpu.memory_space<vmem>>, vector<1x128xf32>
    %68 = arith.addi %0, %55 : i32
    %c2_i32_15 = arith.constant 2 : i32
    %69 = arith.addi %68, %c2_i32_15 : i32
    %70 = arith.index_cast %69 : i32 to index
    %71 = memref.load %arg1[%70] : memref<16xi32, #tpu.memory_space<smem>>
    %72 = arith.index_cast %71 : i32 to index
    %c0_16 = arith.constant 0 : index
    %73 = vector.load %arg2[%72, %c0_16] : memref<32x128xf32, #tpu.memory_space<vmem>>, vector<1x128xf32>
    %74 = arith.addi %0, %55 : i32
    %c3_i32_17 = arith.constant 3 : i32
    %75 = arith.addi %74, %c3_i32_17 : i32
    %76 = arith.index_cast %75 : i32 to index
    %77 = memref.load %arg1[%76] : memref<16xi32, #tpu.memory_space<smem>>
    %78 = arith.index_cast %77 : i32 to index
    %c0_18 = arith.constant 0 : index
    %79 = vector.load %arg2[%78, %c0_18] : memref<32x128xf32, #tpu.memory_space<vmem>>, vector<1x128xf32>
    %80 = arith.addi %0, %55 : i32
    %c4_i32_19 = arith.constant 4 : i32
    %81 = arith.addi %80, %c4_i32_19 : i32
    %82 = arith.index_cast %81 : i32 to index
    %83 = memref.load %arg1[%82] : memref<16xi32, #tpu.memory_space<smem>>
    %84 = arith.index_cast %83 : i32 to index
    %c0_20 = arith.constant 0 : index
    %85 = vector.load %arg2[%84, %c0_20] : memref<32x128xf32, #tpu.memory_space<vmem>>, vector<1x128xf32>
    %86 = arith.addi %0, %55 : i32
    %c5_i32_21 = arith.constant 5 : i32
    %87 = arith.addi %86, %c5_i32_21 : i32
    %88 = arith.index_cast %87 : i32 to index
    %89 = memref.load %arg1[%88] : memref<16xi32, #tpu.memory_space<smem>>
    %90 = arith.index_cast %89 : i32 to index
    %c0_22 = arith.constant 0 : index
    %91 = vector.load %arg2[%90, %c0_22] : memref<32x128xf32, #tpu.memory_space<vmem>>, vector<1x128xf32>
    %92 = arith.addi %0, %55 : i32
    %c6_i32_23 = arith.constant 6 : i32
    %93 = arith.addi %92, %c6_i32_23 : i32
    %94 = arith.index_cast %93 : i32 to index
    %95 = memref.load %arg1[%94] : memref<16xi32, #tpu.memory_space<smem>>
    %96 = arith.index_cast %95 : i32 to index
    %c0_24 = arith.constant 0 : index
    %97 = vector.load %arg2[%96, %c0_24] : memref<32x128xf32, #tpu.memory_space<vmem>>, vector<1x128xf32>
    %98 = arith.addi %0, %55 : i32
    %c7_i32_25 = arith.constant 7 : i32
    %99 = arith.addi %98, %c7_i32_25 : i32
    %100 = arith.index_cast %99 : i32 to index
    %101 = memref.load %arg1[%100] : memref<16xi32, #tpu.memory_space<smem>>
    %102 = arith.index_cast %101 : i32 to index
    %c0_26 = arith.constant 0 : index
    %103 = vector.load %arg2[%102, %c0_26] : memref<32x128xf32, #tpu.memory_space<vmem>>, vector<1x128xf32>
    %104 = tpu.concatenate %61, %67, %73, %79, %85, %91, %97, %103 in 0 : vector<1x128xf32>, vector<1x128xf32>, vector<1x128xf32>, vector<1x128xf32>, vector<1x128xf32>, vector<1x128xf32>, vector<1x128xf32>, vector<1x128xf32> -> vector<8x128xf32>
    %105 = arith.index_cast %55 : i32 to index
    %c0_27 = arith.constant 0 : index
    %106 = vector.load %arg3[%105, %c0_27] : memref<16x128xf32, #tpu.memory_space<vmem>>, vector<8x128xf32>
    tpu.vector_store %arg3[%105, %c0_27], %104 {strides = array<i32>} : memref<16x128xf32, #tpu.memory_space<vmem>>, vector<8x128xf32>,
    %c2_i32_28 = arith.constant 2 : i32
    return
  }
  func.func @transform_0(%arg0: i32, %arg1: memref<16xi32, #tpu.memory_space<smem>>) -> (i32, i32) {
    %c0_i32 = arith.constant 0 : i32
    %c0_i32_0 = arith.constant 0 : i32
    %c0_i32_1 = arith.constant 0 : i32
    return %c0_i32, %c0_i32_0 : i32, i32
  }
  func.func @transform_1(%arg0: i32, %arg1: memref<16xi32, #tpu.memory_space<smem>>) -> (i32, i32) {
    %c0_i32 = arith.constant 0 : i32
    %c0_i32_0 = arith.constant 0 : i32
    return %arg0, %c0_i32 : i32, i32
  }
}

</mosaic_0001>

<bundles_post_ra>
// kernel: tpu_custom_call.1
= control target key start
LH: loop header
LB: loop body
LE: loop exit
PB: predicated region body
PF: predicated region fallthrough
CT: control target
= control target key end

     0   :  { %s360_s0 = inlined_call_operand.hbm [shape: s32[16], index: 0, kind: input, shape index: {}]   ;;  %s361_s1 = inlined_call_operand.hbm [shape: f32[32,128], index: 1, kind: input, shape index: {}]   ;;  %s362_s2 = inlined_call_operand.hbm [shape: f32[16,128], index: 2, kind: output, shape index: {}]  }
   0x1   :  { %s212_s11 = scalar_lea.hbm %s360_s0, 16 }
   0x2   :  { %p213_p0 = scmp.ne.s32.totalorder %s360_s0, %s212_s11  ;;  %p216_p1 = scmp.lt.u32.totalorder %s212_s11, %s360_s0 }
   0x4   :  { %p218_p2 = pnand %p216_p1, %p213_p0 }
   0x6   :  { %221 = shalt.err (!%p218_p2)  }
   0x7   :  { %s272_s16 = smov [#allocation3]  }
   0x8   :  { %8 = dma.hbm_to_smem %s360_s0, 16, %s272_s16, [#allocation2] }
   0x9   :  { %266 = dma.done.wait [#allocation2], 16 }
   0xa   :  { %267 = vsyncadd [#allocation2], 4294967280 }
   0xb   :  { %10 = sfence }
   0xc   :  { %11 = vsyncpa [#allocation5], 0 }
   0xd   :  { %12 = vsyncpa [#allocation6], 0  ;;  %s273_s19 = smov [#allocation4]   ;;  %s222_s23 = scalar_lea.hbm %s361_s1, 512 }
   0xe   :  { %s18_s20 = sshll.u32 %s273_s19, 4  ;;  %p223_p3 = scmp.ne.s32.totalorder %s361_s1, %s222_s23  ;;  %s19_s20 = int_to_ptr.vmem [resolvable:$true] %s18_s20 }
   0xf   :  { %p226_p4 = scmp.lt.u32.totalorder %s222_s23, %s361_s1 }
  0x11   :  { %p228_p5 = pnand %p226_p4, %p223_p3 }
  0x13   :  { %231 = shalt.err (!%p228_p5)
}
  0x14   :  { %s232_s0 = scalar_lea.vmem %s19_s20, 512  ;;  %p237_p7 = scmp.lt.s32.totalorder %s19_s20, %s19_s20 }
  0x15   :  { %p233_p6 = scmp.ne.s32.totalorder %s19_s20, %s232_s0  ;;  %p238_p8 = scmp.lt.s32.totalorder %s232_s0, %s232_s0 }
  0x17   :  { %p239_p9 = por %p238_p8, %p237_p7 }
  0x19   :  { %p240_p10 = pnand %p239_p9, %p233_p6 }
  0x1b   :  { %243 = shalt.err (!%p240_p10)
}
  0x1c   :  { %s274_s28 = smov 128   ;;  %s275_s29 = smov 8  }
  0x1d   :  { %24 = dma.hbm_to_vmem [thread:$0]  %s361_s1, 512, %s19_s20, [#allocation5], %s274_s28, %s274_s28, %s275_s29  }
  0x1e   :  { %268 = dma.done.wait [#allocation5], 512  }
  0x1f   :  { %269 = vsyncadd [#allocation5], 4294966784  ;;  %s30_s4 = sld [smem:[#allocation3]]  ;;  %s192_s5 = sld [smem:[#allocation3 + $0x1]]  ;;  %vm82_vm0 = vcmask 1040384   ;;  %vm84_vm1 = vcmask 1041408  }
  0x20   :  { %s193_s6 = sld [smem:[#allocation3 + $0x2]]  ;;  %s194_s7 = sld [smem:[#allocation3 + $0x3]]  ;;  %vm86_vm2 = vcmask 1042432   ;;  %vm88_vm3 = vcmask 1043456   ;;  %vm90_vm4 = vcmask 1044480   ;;  %vm92_vm5 = vcmask 1045504  }
  0x21   :  { %s195_s8 = sld [smem:[#allocation3 + $0x4]]  ;;  %s196_s9 = sld [smem:[#allocation3 + $0x5]]  ;;  %vm94_vm6 = vcmask 1046528  }
  0x22   :  { %s197_s10 = sld [smem:[#allocation3 + $0x6]]  ;;  %s198_s11 = sld [smem:[#allocation3 + $0x7]] }
  0x23   :  { %s319_s12 = sld [smem:[#allocation3 + $0x8]]  ;;  %s321_s13 = sld [smem:[#allocation3 + $0x9]] }
  0x24   :  { %s323_s14 = sld [smem:[#allocation3 + $0xa]]  ;;  %s325_s15 = sld [smem:[#allocation3 + $0xb]] }
  0x25   :  { %s31_s1 = scalar_lea.vmem [#allocation4], %s30_s4  ;;  %s35_s16 = scalar_lea.vmem [#allocation4], %s192_s5 }
  0x26   :  { %v32_v0 = vld [vmem:[%s31_s1] sm:$0x1]  ;;  %s39_s17 = scalar_lea.vmem [#allocation4], %s193_s6  ;;  %s43_s18 = scalar_lea.vmem [#allocation4], %s194_s7 }
  0x27   :  { %v36_v1 = vld [vmem:[%s35_s16] sm:$0x1]  ;;  %s47_s19 = scalar_lea.vmem [#allocation4], %s195_s8  ;;  %s51_s20 = scalar_lea.vmem [#allocation4], %s196_s9 }
  0x28   :  { %v40_v2 = vld [vmem:[%s39_s17] sm:$0x1]  ;;  %s55_s21 = scalar_lea.vmem [#allocation4], %s197_s10  ;;  %s59_s22 = scalar_lea.vmem [#allocation4], %s198_s11  ;;  %v62_v8 = vrot.slane %v36_v1, 7 }
  0x29   :  { %v44_v3 = vld [vmem:[%s43_s18] sm:$0x1]  ;;  %v65_v9 = vrot.slane %v40_v2, 6  ;;  %s99_s23 = scalar_lea.vmem [#allocation4], %s319_s12  ;;  %s103_s24 = scalar_lea.vmem [#allocation4], %s321_s13 }
  0x2a   :  { %v48_v4 = vld [vmem:[%s47_s19] sm:$0x1]  ;;  %v68_v10 = vrot.slane %v44_v3, 5  ;;  %v83_v15 = vsel %vm82_vm0, %v32_v0, %v62_v8  ;;  %s107_s25 = scalar_lea.vmem [#allocation4], %s323_s14  ;;  %s203_s26 = sld [smem:[#allocation3 + $0xc]] }
  0x2b   :  { %v52_v5 = vld [vmem:[%s51_s20] sm:$0x1]  ;;  %v71_v11 = vrot.slane %v48_v4, 4  ;;  %v85_v18 = vsel %vm84_vm1, %v83_v15, %v65_v9  ;;  %s111_s27 = scalar_lea.vmem [#allocation4], %s325_s15  ;;  %s204_s0 = sld [smem:[#allocation3 + $0xd]] }
  0x2c   :  { %v56_v6 = vld [vmem:[%s55_s21] sm:$0x1]  ;;  %v74_v12 = vrot.slane %v52_v5, 3  ;;  %v87_v21 = vsel %vm86_vm2, %v85_v18, %v68_v10  ;;  %s205_s30 = sld [smem:[#allocation3 + $0xe]]  ;;  %s206_s3 = sld [smem:[#allocation3 + $0xf]] }
  0x2d   :  { %v60_v7 = vld [vmem:[%s59_s22] sm:$0x1]  ;;  %v77_v13 = vrot.slane %v56_v6, 2  ;;  %v89_v23 = vsel %vm88_vm3, %v87_v21, %v71_v11  ;;  %s276_s8 = smov [#allocation7]  }
  0x2e   :  { %v80_v14 = vrot.slane %v60_v7, 1  ;;  %v100_v16 = vld [vmem:[%s99_s23] sm:$0x1]  ;;  %v91_v26 = vsel %vm90_vm4, %v89_v23, %v74_v12  ;;  %s164_s9 = sshll.u32 %s276_s8, 4  ;;  %s165_s9 = int_to_ptr.vmem [resolvable:$true] %s164_s9 }
  0x2f   :  { %v104_v17 = vld [vmem:[%s103_s24] sm:$0x1]  ;;  %v93_v28 = vsel %vm92_vm5, %v91_v26, %v77_v13  ;;  %s244_s10 = scalar_lea.vmem %s165_s9, 256  ;;  %p249_p12 = scmp.lt.s32.totalorder %s165_s9, %s165_s9 }
  0x30   :  { %v108_v19 = vld [vmem:[%s107_s25] sm:$0x1]  ;;  %v130_v20 = vrot.slane %v104_v17, 7  ;;  %v95_v30 = vsel %vm94_vm6, %v93_v28, %v80_v14  ;;  %s115_s4 = scalar_lea.vmem [#allocation4], %s203_s26  ;;  %p245_p11 = scmp.ne.s32.totalorder %s165_s9, %s244_s10 }
  0x31   :  { %v112_v22 = vld [vmem:[%s111_s27] sm:$0x1]  ;;  %v133_v24 = vrot.slane %v108_v19, 6  ;;  %96 = vst [vmem:[#allocation7] sm:$0xff] %v95_v30  ;;  %s119_s5 = scalar_lea.vmem [#allocation4], %s204_s0  ;;  %p250_p13 = scmp.lt.s32.totalorder %s244_s10, %s244_s10 }
  0x32   :  { %v150_v25 = vsel %vm82_vm0, %v100_v16, %v130_v20  ;;  %v136_v27 = vrot.slane %v112_v22, 5  ;;  %v116_v31 = vld [vmem:[%s115_s4] sm:$0x1]  ;;  %s123_s6 = scalar_lea.vmem [#allocation4], %s205_s30  ;;  %s127_s7 = scalar_lea.vmem [#allocation4], %s206_s3 }
  0x33   :  { %v151_v29 = vsel %vm84_vm1, %v150_v25, %v133_v24  ;;  %v120_v33 = vld [vmem:[%s119_s5] sm:$0x1]  ;;  %v139_v35 = vrot.slane %v116_v31, 4  ;;  %p251_p0 = por %p250_p13, %p249_p12 }
  0x34   :  { %v152_v32 = vsel %vm86_vm2, %v151_v29, %v136_v27  ;;  %v124_v34 = vld [vmem:[%s123_s6] sm:$0x1]  ;;  %v142_v37 = vrot.slane %v120_v33, 3 }
  0x35   :  { %v128_v36 = vld [vmem:[%s127_s7] sm:$0x1]  ;;  %v145_v38 = vrot.slane %v124_v34, 2  ;;  %v153_v40 = vsel %vm88_vm3, %v152_v32, %v139_v35  ;;  %p252_p1 = pnand %p251_p0, %p245_p11 }
  0x36   :  { %v148_v39 = vrot.slane %v128_v36, 1  ;;  %v154_v41 = vsel %vm90_vm4, %v153_v40, %v142_v37 }
  0x37   :  { %v155_v42 = vsel %vm92_vm5, %v154_v41, %v145_v38 }
  0x38   :  { %v156_v43 = vsel %vm94_vm6, %v155_v42, %v148_v39 }
  0x39   :  { %158 = vst [vmem:[#allocation7 + $0x8] sm:$0xff] %v156_v43 }
  0x3a   :  { %255 = shalt.err (!%p252_p1)
}
  0x3b   :  { %s256_s13 = scalar_lea.hbm %s362_s2, 256 }
  0x3c   :  { %p257_p2 = scmp.ne.s32.totalorder %s362_s2, %s256_s13  ;;  %p260_p3 = scmp.lt.u32.totalorder %s256_s13, %s362_s2 }
  0x3e   :  { %p262_p4 = pnand %p260_p3, %p257_p2 }
  0x40   :  { %265 = shalt.err (!%p262_p4)
}
  0x41   :  { %170 = dma.vmem_to_hbm [thread:$0]  %s165_s9, 256, %s362_s2, [#allocation6], %s274_s28, %s274_s28, %s275_s29  }
  0x42   :  { %270 = dma.done.wait [#allocation6], 256  }
  0x43   :  { %271 = vsyncadd [#allocation6], 4294967040 }
  0x44   :  { %174 = vsyncpa [#allocation5], 1 }
  0x45   :  { %175 = vsyncpa [#allocation6], 1 }

</bundles_post_ra>
